<compile_context>
chip_gen: v7x
topology: tpu7x:2x2x1
jax: 0.10.0
libtpu: 0.0.40
codegen_flags: <defaults>
</compile_context>

<pallas_src>
import jax
import jax.numpy as jnp
from jax.experimental import pallas as pl
from jax.experimental.pallas import tpu as pltpu


def _round_up(x, m):
    return ((x + m - 1) // m) * m


def _pad2(x, rows, cols, dtype):
    """Zero-pad a 2-D array to (rows, cols) in `dtype`; no-op copy if aligned."""
    x = x.astype(dtype)
    if x.shape == (rows, cols):
        return x
    return jnp.zeros((rows, cols), dtype).at[: x.shape[0], : x.shape[1]].set(x)


def _res_kernel(x_ref, w1_ref, b1_ref, w2_ref, b2_ref, o_ref):
    x = x_ref[...]                                            # (tm, dim_p)

    # Layer 1: Linear (f32 MXU accumulation) + bias + SiLU (f32 VPU/EUP).
    h1 = jnp.dot(x, w1_ref[...], preferred_element_type=jnp.float32)
    h1 = h1 + b1_ref[...]
    h1 = h1 * jax.nn.sigmoid(h1)                              # SiLU

    # Layer 2: cast back to the compute dtype for the MXU push, acc in f32.
    h2 = jnp.dot(h1.astype(w2_ref.dtype), w2_ref[...],
                 preferred_element_type=jnp.float32)
    h2 = h2 + b2_ref[...]
    h2 = h2 * jax.nn.sigmoid(h2)                              # SiLU

    # Residual add in f32; single full-tile lane-dense (unmasked) store.
    o_ref[...] = (h2 + x.astype(jnp.float32)).astype(o_ref.dtype)


def res_forward(m, w1, b1, w2, b2, *, tm=512, compute_dtype=None):
    """m: [N, dim]; w*: [dim, dim] laid out (in, out); b*: [1, dim].

    compute_dtype: dtype of activations/weights fed to the MXU (default:
    m.dtype). Accumulation, biases, SiLU and the residual stay f32.
    """
    N, dim = m.shape
    out_dtype = m.dtype
    if compute_dtype is None:
        compute_dtype = m.dtype

    # Lane-dense feature axis: pad dim up to a multiple of 128.
    dim_p = _round_up(max(dim, 128), 128)

    # Row tile: multiple of 128, at most the row-padded problem size.
    tm_eff = max(128, min(_round_up(tm, 128), _round_up(N, 128)))
    n_p = _round_up(N, tm_eff)
    grid = (n_p // tm_eff,)

    # Zero-pad inputs/params (skipped when already aligned).
    m_p = _pad2(m, n_p, dim_p, compute_dtype)
    w1_p = _pad2(w1, dim_p, dim_p, compute_dtype)
    w2_p = _pad2(w2, dim_p, dim_p, compute_dtype)
    b1_p = _pad2(b1, 1, dim_p, jnp.float32)
    b2_p = _pad2(b2, 1, dim_p, jnp.float32)

    itemsize = jnp.dtype(compute_dtype).itemsize
    # Rough VMEM budget: double-buffered x/out tiles + resident W1/W2 + biases
    # + the f32 intermediates inside the body.
    vmem_need = (2 * tm_eff * dim_p * itemsize            # x tiles (2 bufs)
                 + 2 * tm_eff * dim_p * jnp.dtype(out_dtype).itemsize  # out tiles
                 + 2 * dim_p * dim_p * itemsize            # W1 + W2 resident
                 + 2 * dim_p * 4                           # biases (f32)
                 + 3 * tm_eff * dim_p * 4)                 # f32 temporaries
    vmem_limit = None
    if vmem_need > 24 * 1024 * 1024:
        vmem_limit = int(min(2 * vmem_need, 64 * 1024 * 1024))

    out = pl.pallas_call(
        _res_kernel,
        out_shape=jax.ShapeDtypeStruct((n_p, dim_p), out_dtype),
        grid_spec=pltpu.PrefetchScalarGridSpec(
            num_scalar_prefetch=0,
            grid=grid,
            in_specs=[
                pl.BlockSpec((tm_eff, dim_p), lambda i: (i, 0)),   # x tile
                pl.BlockSpec((dim_p, dim_p), lambda i: (0, 0)),    # W1 (resident)
                pl.BlockSpec((1, dim_p), lambda i: (0, 0)),        # b1 (resident)
                pl.BlockSpec((dim_p, dim_p), lambda i: (0, 0)),    # W2 (resident)
                pl.BlockSpec((1, dim_p), lambda i: (0, 0)),        # b2 (resident)
            ],
            out_specs=pl.BlockSpec((tm_eff, dim_p), lambda i: (i, 0)),
        ),
        compiler_params=pltpu.CompilerParams(
            dimension_semantics=("parallel",),       # rows shard across v7x TCs
            vmem_limit_bytes=vmem_limit),
    )(m_p, w1_p, b1_p, w2_p, b2_p)

    if (n_p, dim_p) == (N, dim):
        return out
    return out[:N, :dim]


def reference_forward(m, w1, b1, w2, b2):
    """Pure-JAX reference of the PyTorch Res forward."""
    h1 = m @ w1 + b1
    h1 = h1 * jax.nn.sigmoid(h1)
    h2 = h1 @ w2 + b2
    h2 = h2 * jax.nn.sigmoid(h2)
    return h2 + m


if __name__ == "__main__":
    key = jax.random.PRNGKey(0)
    k_m, k_w1, k_b1, k_w2, k_b2 = jax.random.split(key, 5)

    # Small demo shapes consistent with the module: 16 messages, hidden dim 32.
    N, dim = 16, 32
    bound = 1.0 / (dim ** 0.5)
    m = jax.random.normal(k_m, (N, dim), dtype=jnp.float32)
    w1 = jax.random.uniform(k_w1, (dim, dim), jnp.float32, -bound, bound)
    b1 = jax.random.uniform(k_b1, (1, dim), jnp.float32, -bound, bound)
    w2 = jax.random.uniform(k_w2, (dim, dim), jnp.float32, -bound, bound)
    b2 = jax.random.uniform(k_b2, (1, dim), jnp.float32, -bound, bound)

    # 1) fp32 path, tiny ragged shape (exercises row + lane padding).
    out = jax.block_until_ready(res_forward(m, w1, b1, w2, b2))
    ref = reference_forward(m, w1, b1, w2, b2)
    assert jnp.allclose(out, ref, atol=1e-5, rtol=1e-5), "fp32 mismatch vs reference"

    # 2) fp32 path at a larger ragged shape (multiple grid steps, non-aligned N/dim).
    N2, dim2 = 300, 96
    k2 = jax.random.split(key, 6)
    m2 = jax.random.normal(k2[0], (N2, dim2), dtype=jnp.float32)
    b2d = 1.0 / (dim2 ** 0.5)
    w1b = jax.random.uniform(k2[1], (dim2, dim2), jnp.float32, -b2d, b2d)
    b1b = jax.random.uniform(k2[2], (1, dim2), jnp.float32, -b2d, b2d)
    w2b = jax.random.uniform(k2[3], (dim2, dim2), jnp.float32, -b2d, b2d)
    b2b = jax.random.uniform(k2[4], (1, dim2), jnp.float32, -b2d, b2d)
    out2 = jax.block_until_ready(res_forward(m2, w1b, b1b, w2b, b2b, tm=128))
    ref2 = reference_forward(m2, w1b, b1b, w2b, b2b)
    assert jnp.allclose(out2, ref2, atol=1e-4, rtol=1e-4), "fp32 (large) mismatch"

    # 3) bf16 I/O path (memory-bound regime optimization), looser tolerance.
    out_bf16 = jax.block_until_ready(
        res_forward(m2, w1b, b1b, w2b, b2b, tm=128, compute_dtype=jnp.bfloat16))
    assert jnp.allclose(out_bf16, ref2, atol=0.1, rtol=0.1), "bf16 mismatch"

    print("KERNEL_OK")
</pallas_src>

<mosaic_0001>
module attributes {stable_mosaic.version = 11 : i64} {
  func.func @_res_kernel(%arg0: i32, %arg1: memref<128x128xf32, #tpu.memory_space<vmem>>, %arg2: memref<128x128xf32, #tpu.memory_space<vmem>>, %arg3: memref<1x128xf32, #tpu.memory_space<vmem>>, %arg4: memref<128x128xf32, #tpu.memory_space<vmem>>, %arg5: memref<1x128xf32, #tpu.memory_space<vmem>>, %arg6: memref<128x128xf32, #tpu.memory_space<vmem>>) attributes {dimension_semantics = [#tpu.dimension_semantics<parallel>], iteration_bounds = array<i64: 1>, scalar_prefetch = 0 : i64, scratch_operands = 0 : i64, tpu.core_type = #tpu.core_type<tc>, window_params = [{transform_indices = @transform_0, window_bounds = array<i64: 128, 128>}, {pipeline_mode = #tpu.pipeline_mode<synchronous>, transform_indices = @transform_1, window_bounds = array<i64: 128, 128>}, {pipeline_mode = #tpu.pipeline_mode<synchronous>, transform_indices = @transform_2, window_bounds = array<i64: 1, 128>}, {pipeline_mode = #tpu.pipeline_mode<synchronous>, transform_indices = @transform_3, window_bounds = array<i64: 128, 128>}, {pipeline_mode = #tpu.pipeline_mode<synchronous>, transform_indices = @transform_4, window_bounds = array<i64: 1, 128>}, {transform_indices = @transform_5, window_bounds = array<i64: 128, 128>}]} {
    %c0 = arith.constant 0 : index
    %c0_0 = arith.constant 0 : index
    %0 = vector.load %arg1[%c0, %c0_0] : memref<128x128xf32, #tpu.memory_space<vmem>>, vector<128x128xf32>
    %c0_1 = arith.constant 0 : index
    %c0_2 = arith.constant 0 : index
    %1 = vector.load %arg2[%c0_1, %c0_2] : memref<128x128xf32, #tpu.memory_space<vmem>>, vector<128x128xf32>
    %cst = arith.constant dense<0.000000e+00> : vector<128x128xf32>
    %2 = tpu.matmul %0, %1, %cst {dimension_numbers = #tpu.dot_dimension_numbers<[1], [0], [0], [1], [0, 0, 1, 1], [], []>} : vector<128x128xf32>, vector<128x128xf32>, vector<128x128xf32> -> vector<128x128xf32>
    %c0_3 = arith.constant 0 : index
    %c0_4 = arith.constant 0 : index
    %3 = vector.load %arg3[%c0_3, %c0_4] : memref<1x128xf32, #tpu.memory_space<vmem>>, vector<1x128xf32>
    %4 = vector.broadcast %3 : vector<1x128xf32> to vector<128x128xf32>
    %5 = arith.addf %2, %4 : vector<128x128xf32>
    %6 = arith.negf %5 : vector<128x128xf32>
    %7 = math.exp %6 : vector<128x128xf32>
    %cst_5 = arith.constant 1.000000e+00 : f32
    %8 = vector.broadcast %cst_5 : f32 to vector<128x128xf32>
    %9 = arith.addf %8, %7 : vector<128x128xf32>
    %10 = arith.divf %8, %9 : vector<128x128xf32>
    %11 = arith.mulf %5, %10 : vector<128x128xf32>
    %c0_6 = arith.constant 0 : index
    %c0_7 = arith.constant 0 : index
    %12 = vector.load %arg4[%c0_6, %c0_7] : memref<128x128xf32, #tpu.memory_space<vmem>>, vector<128x128xf32>
    %cst_8 = arith.constant dense<0.000000e+00> : vector<128x128xf32>
    %13 = tpu.matmul %11, %12, %cst_8 {dimension_numbers = #tpu.dot_dimension_numbers<[1], [0], [0], [1], [0, 0, 1, 1], [], []>} : vector<128x128xf32>, vector<128x128xf32>, vector<128x128xf32> -> vector<128x128xf32>
    %c0_9 = arith.constant 0 : index
    %c0_10 = arith.constant 0 : index
    %14 = vector.load %arg5[%c0_9, %c0_10] : memref<1x128xf32, #tpu.memory_space<vmem>>, vector<1x128xf32>
    %15 = vector.broadcast %14 : vector<1x128xf32> to vector<128x128xf32>
    %16 = arith.addf %13, %15 : vector<128x128xf32>
    %17 = arith.negf %16 : vector<128x128xf32>
    %18 = math.exp %17 : vector<128x128xf32>
    %cst_11 = arith.constant 1.000000e+00 : f32
    %19 = vector.broadcast %cst_11 : f32 to vector<128x128xf32>
    %20 = arith.addf %19, %18 : vector<128x128xf32>
    %21 = arith.divf %19, %20 : vector<128x128xf32>
    %22 = arith.mulf %16, %21 : vector<128x128xf32>
    %23 = arith.addf %22, %0 : vector<128x128xf32>
    %c0_12 = arith.constant 0 : index
    %c0_13 = arith.constant 0 : index
    %24 = vector.load %arg6[%c0_12, %c0_13] : memref<128x128xf32, #tpu.memory_space<vmem>>, vector<128x128xf32>
    tpu.vector_store %arg6[%c0_12, %c0_13], %23 {strides = array<i32>} : memref<128x128xf32, #tpu.memory_space<vmem>>, vector<128x128xf32>,
    return
  }
  func.func @transform_0(%arg0: i32) -> (i32, i32) {
    %c0_i32 = arith.constant 0 : i32
    %c0_i32_0 = arith.constant 0 : i32
    return %arg0, %c0_i32 : i32, i32
  }
  func.func @transform_1(%arg0: i32) -> (i32, i32) {
    %c0_i32 = arith.constant 0 : i32
    %c0_i32_0 = arith.constant 0 : i32
    %c0_i32_1 = arith.constant 0 : i32
    return %c0_i32, %c0_i32_0 : i32, i32
  }
  func.func @transform_2(%arg0: i32) -> (i32, i32) {
    %c0_i32 = arith.constant 0 : i32
    %c0_i32_0 = arith.constant 0 : i32
    %c0_i32_1 = arith.constant 0 : i32
    return %c0_i32, %c0_i32_0 : i32, i32
  }
  func.func @transform_3(%arg0: i32) -> (i32, i32) {
    %c0_i32 = arith.constant 0 : i32
    %c0_i32_0 = arith.constant 0 : i32
    %c0_i32_1 = arith.constant 0 : i32
    return %c0_i32, %c0_i32_0 : i32, i32
  }
  func.func @transform_4(%arg0: i32) -> (i32, i32) {
    %c0_i32 = arith.constant 0 : i32
    %c0_i32_0 = arith.constant 0 : i32
    %c0_i32_1 = arith.constant 0 : i32
    return %c0_i32, %c0_i32_0 : i32, i32
  }
  func.func @transform_5(%arg0: i32) -> (i32, i32) {
    %c0_i32 = arith.constant 0 : i32
    %c0_i32_0 = arith.constant 0 : i32
    return %arg0, %c0_i32 : i32, i32
  }
}

</mosaic_0001>

<bundles_post_ra>
// kernel: tpu_custom_call.1
= control target key start
LH: loop header
LB: loop body
LE: loop exit
PB: predicated region body
PF: predicated region fallthrough
CT: control target
= control target key end

     0   :  { %10 = vsyncpa [#allocation3], 0  ;;  %s1527_s0 = inlined_call_operand.hbm [shape: f32[128,128], index: 0, kind: input, shape index: {}]   ;;  %s1528_s1 = inlined_call_operand.hbm [shape: f32[128,128], index: 1, kind: input, shape index: {}]   ;;  %s1529_s2 = inlined_call_operand.vmem [shape: f32[1,128], index: 2, kind: input, shape index: {}]   ;;  %s1530_s3 = inlined_call_operand.hbm [shape: f32[128,128], index: 3, kind: input, shape index: {}]   ;;  %s1531_s4 = inlined_call_operand.vmem [shape: f32[1,128], index: 4, kind: input, shape index: {}]   ;;  %s1532_s5 = inlined_call_operand.hbm [shape: f32[128,128], index: 5, kind: output, shape index: {}]  }
   0x1   :  { %11 = vsyncpa [#allocation6], 0 }
   0x2   :  { %12 = vsyncpa [#allocation4], 0  ;;  %s1190_s18 = smov [#allocation5]   ;;  %s1191_s20 = smov [#allocation2]  }
   0x3   :  { %s30_s19 = sshll.u32 %s1190_s18, 4  ;;  %s18_s21 = sshll.u32 %s1191_s20, 4  ;;  %s31_s19 = int_to_ptr.vmem [resolvable:$true] %s30_s19  ;;  %s1226_s21 = int_to_ptr.vmem [resolvable:$true] %s18_s21 }
   0x4   :  { %s1096_s24 = scalar_lea.hbm %s1528_s1, 2048 }
   0x5   :  { %p1097_p0 = scmp.ne.s32.totalorder %s1528_s1, %s1096_s24  ;;  %p1100_p1 = scmp.lt.u32.totalorder %s1096_s24, %s1528_s1 }
   0x7   :  { %p1102_p2 = pnand %p1100_p1, %p1097_p0 }
   0x9   :  { %1105 = shalt.err (!%p1102_p2)
}
   0xa   :  { %s1106_s29 = scalar_lea.vmem %s31_s19, 2048  ;;  %p1111_p4 = scmp.lt.s32.totalorder %s31_s19, %s31_s19 }
   0xb   :  { %p1107_p3 = scmp.ne.s32.totalorder %s31_s19, %s1106_s29  ;;  %p1112_p5 = scmp.lt.s32.totalorder %s1106_s29, %s1106_s29 }
   0xd   :  { %p1113_p6 = por %p1112_p5, %p1111_p4 }
   0xf   :  { %p1114_p7 = pnand %p1113_p6, %p1107_p3 }
  0x11   :  { %1117 = shalt.err (!%p1114_p7)
}
  0x12   :  { %s1192_s30 = smov 128   ;;  %s1193_s6 = smov 8  }
  0x13   :  { %36 = dma.hbm_to_vmem [thread:$0]  %s1528_s1, 2048, %s31_s19, [#allocation6], %s1192_s30, %s1192_s30, %s1193_s6  }
  0x14   :  { %s1118_s11 = scalar_lea.hbm %s1527_s0, 2048 }
  0x15   :  { %p1119_p8 = scmp.ne.s32.totalorder %s1527_s0, %s1118_s11  ;;  %p1122_p9 = scmp.lt.u32.totalorder %s1118_s11, %s1527_s0 }
  0x17   :  { %p1124_p10 = pnand %p1122_p9, %p1119_p8 }
  0x19   :  { %1127 = shalt.err (!%p1124_p10)
}
  0x1a   :  { %s1128_s16 = scalar_lea.vmem %s1226_s21, 2048  ;;  %p1133_p12 = scmp.lt.s32.totalorder %s1226_s21, %s1226_s21 }
  0x1b   :  { %p1129_p11 = scmp.ne.s32.totalorder %s1226_s21, %s1128_s16  ;;  %p1134_p13 = scmp.lt.s32.totalorder %s1128_s16, %s1128_s16 }
  0x1d   :  { %p1135_p0 = por %p1134_p13, %p1133_p12 }
  0x1f   :  { %p1136_p1 = pnand %p1135_p0, %p1129_p11 }
  0x21   :  { %1139 = shalt.err (!%p1136_p1)
}
  0x22   :  { %24 = dma.hbm_to_vmem [thread:$0]  %s1527_s0, 2048, %s1226_s21, [#allocation3], %s1192_s30, %s1192_s30, %s1193_s6  }
  0x23   :  { %s1194_s18 = smov [#allocation7]   ;;  %s1140_s23 = scalar_lea.hbm %s1530_s3, 2048 }
  0x24   :  { %s44_s19 = sshll.u32 %s1194_s18, 4  ;;  %p1141_p2 = scmp.ne.s32.totalorder %s1530_s3, %s1140_s23  ;;  %s45_s19 = int_to_ptr.vmem [resolvable:$true] %s44_s19 }
  0x25   :  { %p1144_p3 = scmp.lt.u32.totalorder %s1140_s23, %s1530_s3 }
  0x27   :  { %p1146_p4 = pnand %p1144_p3, %p1141_p2 }
  0x29   :  { %1149 = shalt.err (!%p1146_p4)
}
  0x2a   :  { %s1150_s28 = scalar_lea.vmem %s45_s19, 2048  ;;  %p1155_p6 = scmp.lt.s32.totalorder %s45_s19, %s45_s19 }
  0x2b   :  { %p1151_p5 = scmp.ne.s32.totalorder %s45_s19, %s1150_s28  ;;  %p1156_p7 = scmp.lt.s32.totalorder %s1150_s28, %s1150_s28 }
  0x2d   :  { %p1157_p8 = por %p1156_p7, %p1155_p6 }
  0x2f   :  { %p1158_p9 = pnand %p1157_p8, %p1151_p5 }
  0x31   :  { %1161 = shalt.err (!%p1158_p9)
}
  0x32   :  { %50 = dma.hbm_to_vmem [thread:$0]  %s1530_s3, 2048, %s45_s19, [#allocation6], %s1192_s30, %s1192_s30, %s1193_s6  }
  0x33   :  { %1184 = dma.done.wait [#allocation3], 2048  }
  0x34   :  { %1185 = vsyncadd [#allocation3], 4294965248 }
  0x35   :  { %1186 = dma.done.wait [#allocation6], 4096  }
  0x36   :  { %1187 = vsyncadd [#allocation6], 4294963200  ;;  %v78_v0 = vld [vmem:[#allocation5] sm:$0xff]  ;;  %v79_v1 = vld [vmem:[#allocation5 + $0x8] sm:$0xff] }
  0x37   :  { %v80_v2 = vld [vmem:[#allocation5 + $0x10] sm:$0xff]  ;;  %v898_v3 = vpack.c.bf16 %v79_v1, %v78_v0  ;;  %v81_v4 = vld [vmem:[#allocation5 + $0x18] sm:$0xff]  ;;  %v82_v6 = vld [vmem:[#allocation5 + $0x20] sm:$0xff] }
  0x38   :  { %v902_v5 = vpack.c.bf16 %v81_v4, %v80_v2  ;;  %v83_v7 = vld [vmem:[#allocation5 + $0x28] sm:$0xff]  ;;  %v1278_v9 = vld [vmem:[#allocation2] sm:$0xff]  ;;  %v84_v10 = vld [vmem:[#allocation5 + $0x30] sm:$0xff] }
  0x39   :  { %899 = vmatprep.subr.bf16.mxu0 %v898_v3  ;;  %v906_v8 = vpack.c.bf16 %v83_v7, %v82_v6  ;;  %v85_v11 = vld [vmem:[#allocation5 + $0x38] sm:$0xff]  ;;  %818 = vmatprep.mubr.f32.mxu0 %v1278_v9  ;;  %v86_v13 = vld [vmem:[#allocation5 + $0x40] sm:$0xff]  ;;  %v87_v14 = vld [vmem:[#allocation5 + $0x48] sm:$0xff] }
  0x3a   :  { %901 = vmatpush3.bf16.msra.mxu0 %v898_v3  ;;  %v910_v12 = vpack.c.bf16 %v85_v11, %v84_v10  ;;  %v914_v15 = vpack.c.bf16 %v87_v14, %v86_v13  ;;  %v88_v16 = vld [vmem:[#allocation5 + $0x50] sm:$0xff]  ;;  %v89_v17 = vld [vmem:[#allocation5 + $0x58] sm:$0xff]  ;;  %v90_v19 = vld [vmem:[#allocation5 + $0x60] sm:$0xff] }
  0x3b   :  { %903 = vmatprep.subr.bf16.mxu0 %v902_v5  ;;  %v918_v18 = vpack.c.bf16 %v89_v17, %v88_v16  ;;  %v91_v20 = vld [vmem:[#allocation5 + $0x68] sm:$0xff]  ;;  %v92_v22 = vld [vmem:[#allocation5 + $0x70] sm:$0xff]  ;;  %v93_v23 = vld [vmem:[#allocation5 + $0x78] sm:$0xff] }
  0x3c   :  { %v922_v21 = vpack.c.bf16 %v91_v20, %v90_v19  ;;  %v926_v24 = vpack.c.bf16 %v93_v23, %v92_v22  ;;  %v1281_v25 = vld [vmem:[#allocation2 + $0x8] sm:$0xff]  ;;  %v1283_v26 = vld [vmem:[#allocation2 + $0x10] sm:$0xff]  ;;  %v1287_v27 = vld [vmem:[#allocation2 + $0x18] sm:$0xff] }
  0x3d   :  { %v1289_v28 = vld [vmem:[#allocation2 + $0x20] sm:$0xff]  ;;  %v1293_v29 = vld [vmem:[#allocation2 + $0x28] sm:$0xff]  ;;  %v1295_v30 = vld [vmem:[#allocation2 + $0x30] sm:$0xff] }
  0x3e   :  { %905 = vmatpush3.bf16.msra.mxu0 %v902_v5  ;;  %v1299_v31 = vld [vmem:[#allocation2 + $0x38] sm:$0xff]  ;;  %v1301_v32 = vld [vmem:[#allocation2 + $0x40] sm:$0xff]  ;;  %v1305_v33 = vld [vmem:[#allocation2 + $0x48] sm:$0xff] }
  0x3f   :  { %907 = vmatprep.subr.bf16.mxu0 %v906_v8  ;;  %v1307_v34 = vld [vmem:[#allocation2 + $0x50] sm:$0xff]  ;;  %v1311_v35 = vld [vmem:[#allocation2 + $0x58] sm:$0xff]  ;;  %v1313_v36 = vld [vmem:[#allocation2 + $0x60] sm:$0xff] }
  0x40   :  { %v1317_v37 = vld [vmem:[#allocation2 + $0x68] sm:$0xff]  ;;  %v1319_v38 = vld [vmem:[#allocation2 + $0x70] sm:$0xff]  ;;  %v1323_v39 = vld [vmem:[#allocation2 + $0x78] sm:$0xff] }
  0x41   :  { %v358_v40 = vld [vmem:[#allocation7] sm:$0xff]  ;;  %v359_v41 = vld [vmem:[#allocation7 + $0x8] sm:$0xff]  ;;  %v360_v43 = vld [vmem:[#allocation7 + $0x10] sm:$0xff] }
  0x42   :  { %909 = vmatpush3.bf16.msra.mxu0 %v906_v8  ;;  %v930_v42 = vpack.c.bf16 %v359_v41, %v358_v40  ;;  %v361_v44 = vld [vmem:[#allocation7 + $0x18] sm:$0xff]  ;;  %v362_v46 = vld [vmem:[#allocation7 + $0x20] sm:$0xff]  ;;  %v363_v47 = vld [vmem:[#allocation7 + $0x28] sm:$0xff] }
  0x43   :  { %911 = vmatprep.subr.bf16.mxu0 %v910_v12  ;;  %v934_v45 = vpack.c.bf16 %v361_v44, %v360_v43  ;;  %v938_v48 = vpack.c.bf16 %v363_v47, %v362_v46  ;;  %v364_v49 = vld [vmem:[#allocation7 + $0x30] sm:$0xff]  ;;  %v365_v50 = vld [vmem:[#allocation7 + $0x38] sm:$0xff]  ;;  %v366_v52 = vld [vmem:[#allocation7 + $0x40] sm:$0xff] }
  0x44   :  { %931 = vmatprep.subr.bf16.mxu1 %v930_v42  ;;  %v942_v51 = vpack.c.bf16 %v365_v50, %v364_v49  ;;  %v367_v53 = vld [vmem:[#allocation7 + $0x48] sm:$0xff]  ;;  %v368_v55 = vld [vmem:[#allocation7 + $0x50] sm:$0xff]  ;;  %v369_v56 = vld [vmem:[#allocation7 + $0x58] sm:$0xff] }
  0x45   :  { %933 = vmatpush3.bf16.msra.mxu1 %v930_v42  ;;  %v946_v54 = vpack.c.bf16 %v367_v53, %v366_v52  ;;  %v950_v57 = vpack.c.bf16 %v369_v56, %v368_v55  ;;  %v370_v58 = vld [vmem:[#allocation7 + $0x60] sm:$0xff]  ;;  %v371_v59 = vld [vmem:[#allocation7 + $0x68] sm:$0xff]  ;;  %v372_v61 = vld [vmem:[#allocation7 + $0x70] sm:$0xff] }
  0x46   :  { %913 = vmatpush3.bf16.msra.mxu0 %v910_v12  ;;  %935 = vmatprep.subr.bf16.mxu1 %v934_v45  ;;  %v954_v60 = vpack.c.bf16 %v371_v59, %v370_v58  ;;  %v373_v62 = vld [vmem:[#allocation7 + $0x78] sm:$0xff]  ;;  %v1329_v0 = vld [vmem:[%s1529_s2] ss:$0 sm:$0xff] }
  0x47   :  { %915 = vmatprep.subr.bf16.mxu0 %v914_v15  ;;  %v958_v63 = vpack.c.bf16 %v373_v62, %v372_v61 }
  0x49   :  { %937 = vmatpush3.bf16.msra.mxu1 %v934_v45 }
  0x4a   :  { %917 = vmatpush3.bf16.msra.mxu0 %v914_v15  ;;  %939 = vmatprep.subr.bf16.mxu1 %v938_v48 }
  0x4b   :  { %919 = vmatprep.subr.bf16.mxu0 %v918_v18 }
  0x4d   :  { %941 = vmatpush3.bf16.msra.mxu1 %v938_v48 }
  0x4e   :  { %921 = vmatpush3.bf16.msra.mxu0 %v918_v18  ;;  %943 = vmatprep.subr.bf16.mxu1 %v942_v51 }
  0x4f   :  { %923 = vmatprep.subr.bf16.mxu0 %v922_v21 }
  0x51   :  { %945 = vmatpush3.bf16.msra.mxu1 %v942_v51 }
  0x52   :  { %925 = vmatpush3.bf16.msra.mxu0 %v922_v21  ;;  %947 = vmatprep.subr.bf16.mxu1 %v946_v54 }
  0x53   :  { %927 = vmatprep.subr.bf16.mxu0 %v926_v24 }
  0x55   :  { %949 = vmatpush3.bf16.msra.mxu1 %v946_v54 }
  0x56   :  { %929 = vmatpush3.bf16.msra.mxu0 %v926_v24  ;;  %951 = vmatprep.subr.bf16.mxu1 %v950_v57 }
  0x59   :  { %819 = vmatmul.mubr.f32.vlgmr.msra.gmra.mrb[0].mxu0 %v1281_v25  ;;  %953 = vmatpush3.bf16.msra.mxu1 %v950_v57 }
  0x5a   :  { %821 = vmatprep.mubr.f32.mxu0 %v1283_v26  ;;  %955 = vmatprep.subr.bf16.mxu1 %v954_v60 }
  0x5d   :  { %822 = vmatmul.mubr.f32.gmra.mrb[2].mxu0 %v1287_v27  ;;  %957 = vmatpush3.bf16.msra.mxu1 %v954_v60 }
  0x5e   :  { %824 = vmatprep.mubr.f32.mxu0 %v1289_v28  ;;  %959 = vmatprep.subr.bf16.mxu1 %v958_v63 }
  0x61   :  { %825 = vmatmul.mubr.f32.gmra.mrb[4].mxu0 %v1293_v29  ;;  %961 = vmatpush3.bf16.msra.mxu1 %v958_v63 }
  0x62   :  { %827 = vmatprep.mubr.f32.mxu0 %v1295_v30 }
  0x65   :  { %828 = vmatmul.mubr.f32.gmra.mrb[6].mxu0 %v1299_v31 }
  0x66   :  { %830 = vmatprep.mubr.f32.mxu0 %v1301_v32 }
  0x69   :  { %831 = vmatmul.mubr.f32.gmra.mrb[8].mxu0 %v1305_v33 }
  0x6a   :  { %833 = vmatprep.mubr.f32.mxu0 %v1307_v34 }
  0x6d   :  { %834 = vmatmul.mubr.f32.gmra.mrb[10].mxu0 %v1311_v35 }
  0x6e   :  { %836 = vmatprep.mubr.f32.mxu0 %v1313_v36 }
  0x71   :  { %837 = vmatmul.mubr.f32.gmra.mrb[12].mxu0 %v1317_v37 }
  0x72   :  { %839 = vmatprep.mubr.f32.mxu0 %v1319_v38 }
  0x75   :  { %840 = vmatmul.mubr.f32.gmra.mrb[14].mxu0 %v1323_v39 }
 0x12c   :  { %v820_v1 = vpop.f32.mrb[0].mxu0 }
 0x12d   :  { %v1332_v2 = vadd.f32 %v820_v1, %v1329_v0  ;;  %v167_v3 = vpop.f32.mrb[1].mxu0 }
 0x12e   :  { %v1335_v4 = vadd.f32 %v1329_v0, %v167_v3 }
 0x12f   :  { %v690_v5 = vmul.f32 -1.442695, %v1332_v2 }
 0x130   :  { %v689_v6 = vmul.f32 -1.442695, %v1335_v4  ;;  %v823_v7 = vpop.f32.mrb[2].mxu0 }
 0x131   :  { %968 = vpow2.f32 %v690_v5  ;;  %v1340_v8 = vadd.f32 %v823_v7, %v1329_v0  ;;  %v177_v10 = vpop.f32.mrb[3].mxu0 }
 0x132   :  { %970 = vpow2.f32 %v689_v6  ;;  %v1343_v11 = vadd.f32 %v1329_v0, %v177_v10 }
 0x133   :  { %v692_v12 = vmul.f32 -1.442695, %v1340_v8 }
 0x134   :  { %v691_v13 = vmul.f32 -1.442695, %v1343_v11  ;;  %v826_v14 = vpop.f32.mrb[4].mxu0 }
 0x135   :  { %972 = vpow2.f32 %v692_v12  ;;  %v1348_v15 = vadd.f32 %v826_v14, %v1329_v0  ;;  %v187_v16 = vpop.f32.mrb[5].mxu0 }
 0x136   :  { %974 = vpow2.f32 %v691_v13  ;;  %v1351_v17 = vadd.f32 %v1329_v0, %v187_v16 }
 0x137   :  { %v694_v18 = vmul.f32 -1.442695, %v1348_v15 }
 0x138   :  { %v693_v19 = vmul.f32 -1.442695, %v1351_v17  ;;  %v829_v20 = vpop.f32.mrb[6].mxu0 }
 0x139   :  { %976 = vpow2.f32 %v694_v18  ;;  %v1356_v21 = vadd.f32 %v829_v20, %v1329_v0  ;;  %v197_v22 = vpop.f32.mrb[7].mxu0 }
 0x13a   :  { %978 = vpow2.f32 %v693_v19  ;;  %v1359_v23 = vadd.f32 %v1329_v0, %v197_v22 }
 0x13b   :  { %v969_v24 = vpop.eup %968  ;;  %v696_v40 = vmul.f32 -1.442695, %v1356_v21 }
 0x13c   :  { %v971_v41 = vpop.eup %970  ;;  %v295_v42 = vadd.f32 1.0, %v969_v24  ;;  %v695_v43 = vmul.f32 -1.442695, %v1359_v23  ;;  %v832_v44 = vpop.f32.mrb[8].mxu0 }
 0x13d   :  { %v294_v45 = vadd.f32 1.0, %v971_v41  ;;  %980 = vpow2.f32 %v696_v40  ;;  %v1364_v46 = vadd.f32 %v832_v44, %v1329_v0  ;;  %v207_v47 = vpop.f32.mrb[9].mxu0 }
 0x13e   :  { %982 = vrcp.f32 %v295_v42  ;;  %v1367_v48 = vadd.f32 %v1329_v0, %v207_v47 }
 0x13f   :  { %v973_v49 = vpop.eup %972  ;;  %984 = vrcp.f32 %v294_v45  ;;  %v698_v50 = vmul.f32 -1.442695, %v1364_v46 }
 0x140   :  { %v975_v51 = vpop.eup %974  ;;  %v297_v52 = vadd.f32 1.0, %v973_v49  ;;  %986 = vpow2.f32 %v695_v43  ;;  %v697_v53 = vmul.f32 -1.442695, %v1367_v48  ;;  %v835_v54 = vpop.f32.mrb[10].mxu0 }
 0x141   :  { %v296_v55 = vadd.f32 1.0, %v975_v51  ;;  %988 = vpow2.f32 %v698_v50  ;;  %v1372_v56 = vadd.f32 %v835_v54, %v1329_v0  ;;  %v217_v57 = vpop.f32.mrb[11].mxu0 }
 0x142   :  { %990 = vrcp.f32 %v297_v52  ;;  %v1375_v58 = vadd.f32 %v1329_v0, %v217_v57 }
 0x143   :  { %v977_v59 = vpop.eup %976  ;;  %992 = vrcp.f32 %v296_v55  ;;  %v700_v60 = vmul.f32 -1.442695, %v1372_v56 }
 0x144   :  { %v979_v61 = vpop.eup %978  ;;  %v299_v62 = vadd.f32 1.0, %v977_v59  ;;  %994 = vpow2.f32 %v697_v53  ;;  %v699_v63 = vmul.f32 -1.442695, %v1375_v58  ;;  %v838_v1 = vpop.f32.mrb[12].mxu0 }
 0x145   :  { %v298_v3 = vadd.f32 1.0, %v979_v61  ;;  %996 = vpow2.f32 %v700_v60  ;;  %v1380_v5 = vadd.f32 %v838_v1, %v1329_v0  ;;  %v227_v6 = vpop.f32.mrb[13].mxu0 }
 0x146   :  { %998 = vrcp.f32 %v299_v62  ;;  %v1383_v7 = vadd.f32 %v1329_v0, %v227_v6 }
 0x147   :  { %v981_v10 = vpop.eup %980  ;;  %1000 = vrcp.f32 %v298_v3  ;;  %v702_v12 = vmul.f32 -1.442695, %v1380_v5 }
 0x148   :  { %v983_v13 = vpop.eup %982  ;;  %v301_v14 = vadd.f32 1.0, %v981_v10  ;;  %1002 = vpow2.f32 %v699_v63  ;;  %v701_v16 = vmul.f32 -1.442695, %v1383_v7  ;;  %v841_v18 = vpop.f32.mrb[14].mxu0 }
 0x149   :  { %v985_v19 = vpop.eup %984  ;;  %1004 = vpow2.f32 %v702_v12  ;;  %v1388_v20 = vadd.f32 %v841_v18, %v1329_v0  ;;  %v237_v22 = vpop.f32.mrb[15].mxu0  ;;  %v343_v43 = vmul.f32 %v983_v13, %v1332_v2 }
 0x14a   :  { %v987_v24 = vpop.eup %986  ;;  %v1391_v40 = vadd.f32 %v1329_v0, %v237_v22  ;;  %v342_v41 = vmul.f32 %v985_v19, %v1335_v4  ;;  %1006 = vpow2.f32 %v701_v16 }
 0x14b   :  { %v989_v42 = vpop.eup %988  ;;  %v300_v44 = vadd.f32 1.0, %v987_v24  ;;  %v704_v45 = vmul.f32 -1.442695, %v1388_v20  ;;  %1008 = vrcp.f32 %v301_v14 }
 0x14c   :  { %v991_v47 = vpop.eup %990  ;;  %v303_v49 = vadd.f32 1.0, %v989_v42  ;;  %v703_v50 = vmul.f32 -1.442695, %v1391_v40  ;;  %874 = vmatprep.mubr.f32.mxu1 %v342_v41 }
 0x14d   :  { %v993_v51 = vpop.eup %992  ;;  %1010 = vrcp.f32 %v300_v44  ;;  %875 = vmatmul.mubr.f32.vlgmr.msra.gmra.mrb[0].mxu1 %v343_v43  ;;  %v345_v2 = vmul.f32 %v991_v47, %v1340_v8 }
 0x14e   :  { %v995_v0 = vpop.eup %994  ;;  %v344_v52 = vmul.f32 %v993_v51, %v1343_v11  ;;  %1012 = vrcp.f32 %v303_v49 }
 0x14f   :  { %v997_v4 = vpop.eup %996  ;;  %v302_v53 = vadd.f32 1.0, %v995_v0  ;;  %1014 = vpow2.f32 %v704_v45 }
 0x150   :  { %v999_v54 = vpop.eup %998  ;;  %v305_v55 = vadd.f32 1.0, %v997_v4  ;;  %1016 = vpow2.f32 %v703_v50  ;;  %877 = vmatprep.mubr.f32.mxu1 %v344_v52 }
 0x151   :  { %v1001_v57 = vpop.eup %1000  ;;  %1018 = vrcp.f32 %v302_v53  ;;  %878 = vmatmul.mubr.f32.gmra.mrb[2].mxu1 %v345_v2  ;;  %v347_v62 = vmul.f32 %v999_v54, %v1348_v15 }
 0x152   :  { %v1003_v59 = vpop.eup %1002  ;;  %v346_v60 = vmul.f32 %v1001_v57, %v1351_v17  ;;  %1020 = vrcp.f32 %v305_v55 }
 0x153   :  { %v1005_v61 = vpop.eup %1004  ;;  %v304_v11 = vadd.f32 1.0, %v1003_v59 }
 0x154   :  { %v307_v63 = vadd.f32 1.0, %v1005_v61  ;;  %880 = vmatprep.mubr.f32.mxu1 %v346_v60  ;;  %v1007_v8 = vpop.eup %1006 }
 0x155   :  { %1022 = vrcp.f32 %v304_v11  ;;  %881 = vmatmul.mubr.f32.gmra.mrb[4].mxu1 %v347_v62  ;;  %v1009_v1 = vpop.eup %1008  ;;  %v306_v3 = vadd.f32 1.0, %v1007_v8 }
 0x156   :  { %1024 = vrcp.f32 %v307_v63  ;;  %v349_v17 = vmul.f32 %v1009_v1, %v1356_v21 }
 0x157   :  { %v1011_v6 = vpop.eup %1010  ;;  %1026 = vrcp.f32 %v306_v3 }
 0x158   :  { %v1013_v10 = vpop.eup %1012  ;;  %v348_v12 = vmul.f32 %v1011_v6, %v1359_v23 }
 0x159   :  { %v1015_v13 = vpop.eup %1014  ;;  %v351_v22 = vmul.f32 %v1013_v10, %v1364_v46 }
 0x15a   :  { %v1017_v14 = vpop.eup %1016  ;;  %v309_v15 = vadd.f32 1.0, %v1015_v13  ;;  %883 = vmatprep.mubr.f32.mxu1 %v348_v12 }
 0x15b   :  { %v1019_v16 = vpop.eup %1018  ;;  %v308_v18 = vadd.f32 1.0, %v1017_v14  ;;  %884 = vmatmul.mubr.f32.gmra.mrb[6].mxu1 %v349_v17 }
 0x15c   :  { %v350_v19 = vmul.f32 %v1019_v16, %v1367_v48  ;;  %1028 = vrcp.f32 %v309_v15  ;;  %v1021_v24 = vpop.eup %1020 }
 0x15d   :  { %1030 = vrcp.f32 %v308_v18  ;;  %v353_v21 = vmul.f32 %v1021_v24, %v1372_v56  ;;  %v1414_v56 = vld [vmem:[%s1531_s4] ss:$0 sm:$0xff]  ;;  %s1195_s4 = smov [#allocation8]  }
 0x15e   :  { %886 = vmatprep.mubr.f32.mxu1 %v350_v19  ;;  %s675_s8 = sshll.u32 %s1195_s4, 4  ;;  %s676_s8 = int_to_ptr.vmem [resolvable:$true] %s675_s8 }
 0x15f   :  { %v1023_v41 = vpop.eup %1022  ;;  %887 = vmatmul.mubr.f32.gmra.mrb[8].mxu1 %v351_v22  ;;  %s1162_s9 = scalar_lea.vmem %s676_s8, 2048  ;;  %p1167_p11 = scmp.lt.s32.totalorder %s676_s8, %s676_s8 }
 0x160   :  { %v352_v23 = vmul.f32 %v1023_v41, %v1375_v58  ;;  %v1025_v42 = vpop.eup %1024  ;;  %p1163_p10 = scmp.ne.s32.totalorder %s676_s8, %s1162_s9  ;;  %p1168_p12 = scmp.lt.s32.totalorder %s1162_s9, %s1162_s9 }
 0x161   :  { %v1027_v43 = vpop.eup %1026  ;;  %v355_v48 = vmul.f32 %v1025_v42, %v1380_v5 }
 0x162   :  { %889 = vmatprep.mubr.f32.mxu1 %v352_v23  ;;  %v354_v44 = vmul.f32 %v1027_v43, %v1383_v7  ;;  %p1169_p13 = por %p1168_p12, %p1167_p11 }
 0x163   :  { %890 = vmatmul.mubr.f32.gmra.mrb[10].mxu1 %v353_v21 }
 0x164   :  { %892 = vmatprep.mubr.f32.mxu1 %v354_v44  ;;  %p1170_p0 = pnand %p1169_p13, %p1163_p10 }
 0x166   :  { %v1029_v45 = vpop.eup %1028 }
 0x167   :  { %v1031_v46 = vpop.eup %1030  ;;  %893 = vmatmul.mubr.f32.gmra.mrb[12].mxu1 %v355_v48  ;;  %v357_v49 = vmul.f32 %v1029_v45, %v1388_v20 }
 0x168   :  { %v356_v47 = vmul.f32 %v1031_v46, %v1391_v40 }
 0x16a   :  { %895 = vmatprep.mubr.f32.mxu1 %v356_v47 }
 0x16b   :  { %896 = vmatmul.mubr.f32.gmra.mrb[14].mxu1 %v357_v49 }
 0x220   :  { %v876_v58 = vpop.f32.mrb[0].mxu1 }
 0x221   :  { %v1417_v7 = vadd.f32 %v876_v58, %v1414_v56  ;;  %v447_v5 = vpop.f32.mrb[1].mxu1 }
 0x222   :  { %v1420_v50 = vadd.f32 %v1414_v56, %v447_v5 }
 0x223   :  { %v707_v51 = vmul.f32 -1.442695, %v1417_v7 }
 0x224   :  { %v706_v40 = vmul.f32 -1.442695, %v1420_v50  ;;  %v879_v20 = vpop.f32.mrb[2].mxu1 }
 0x225   :  { %1032 = vpow2.f32 %v707_v51  ;;  %v1425_v0 = vadd.f32 %v879_v20, %v1414_v56  ;;  %v457_v52 = vpop.f32.mrb[3].mxu1 }
 0x226   :  { %1034 = vpow2.f32 %v706_v40  ;;  %v1428_v4 = vadd.f32 %v1414_v56, %v457_v52 }
 0x227   :  { %v709_v2 = vmul.f32 -1.442695, %v1425_v0 }
 0x228   :  { %v708_v53 = vmul.f32 -1.442695, %v1428_v4  ;;  %v882_v54 = vpop.f32.mrb[4].mxu1 }
 0x229   :  { %1036 = vpow2.f32 %v709_v2  ;;  %v1433_v55 = vadd.f32 %v882_v54, %v1414_v56  ;;  %v467_v57 = vpop.f32.mrb[5].mxu1 }
 0x22a   :  { %1038 = vpow2.f32 %v708_v53  ;;  %v1436_v59 = vadd.f32 %v1414_v56, %v467_v57 }
 0x22b   :  { %v711_v60 = vmul.f32 -1.442695, %v1433_v55 }
 0x22c   :  { %v710_v61 = vmul.f32 -1.442695, %v1436_v59 }
 0x22d   :  { %1040 = vpow2.f32 %v711_v60 }
 0x22e   :  { %1042 = vpow2.f32 %v710_v61  ;;  %v885_v62 = vpop.f32.mrb[6].mxu1 }
 0x22f   :  { %v1033_v11 = vpop.eup %1032  ;;  %v1441_v63 = vadd.f32 %v885_v62, %v1414_v56  ;;  %v477_v8 = vpop.f32.mrb[7].mxu1 }
 0x230   :  { %v1035_v1 = vpop.eup %1034  ;;  %v575_v3 = vadd.f32 1.0, %v1033_v11  ;;  %v1444_v6 = vadd.f32 %v1414_v56, %v477_v8 }
 0x231   :  { %v574_v10 = vadd.f32 1.0, %v1035_v1  ;;  %v713_v12 = vmul.f32 -1.442695, %v1441_v63 }
 0x232   :  { %1044 = vrcp.f32 %v575_v3  ;;  %v712_v13 = vmul.f32 -1.442695, %v1444_v6  ;;  %v888_v17 = vpop.f32.mrb[8].mxu1 }
 0x233   :  { %v1037_v14 = vpop.eup %1036  ;;  %1046 = vrcp.f32 %v574_v10  ;;  %v1449_v15 = vadd.f32 %v888_v17, %v1414_v56  ;;  %v487_v16 = vpop.f32.mrb[9].mxu1 }
 0x234   :  { %v1039_v18 = vpop.eup %1038  ;;  %v577_v19 = vadd.f32 1.0, %v1037_v14  ;;  %1048 = vpow2.f32 %v713_v12  ;;  %v1452_v22 = vadd.f32 %v1414_v56, %v487_v16 }
 0x235   :  { %v576_v24 = vadd.f32 1.0, %v1039_v18  ;;  %1050 = vpow2.f32 %v712_v13  ;;  %v715_v41 = vmul.f32 -1.442695, %v1449_v15 }
 0x236   :  { %1052 = vrcp.f32 %v577_v19  ;;  %v714_v23 = vmul.f32 -1.442695, %v1452_v22  ;;  %v891_v42 = vpop.f32.mrb[10].mxu1 }
 0x237   :  { %v1041_v21 = vpop.eup %1040  ;;  %1054 = vrcp.f32 %v576_v24  ;;  %v1457_v43 = vadd.f32 %v891_v42, %v1414_v56  ;;  %v497_v44 = vpop.f32.mrb[11].mxu1 }
 0x238   :  { %v1043_v48 = vpop.eup %1042  ;;  %v579_v45 = vadd.f32 1.0, %v1041_v21  ;;  %1056 = vpow2.f32 %v715_v41  ;;  %v1460_v46 = vadd.f32 %v1414_v56, %v497_v44 }
 0x239   :  { %v578_v47 = vadd.f32 1.0, %v1043_v48  ;;  %1058 = vpow2.f32 %v714_v23  ;;  %v717_v49 = vmul.f32 -1.442695, %v1457_v43 }
 0x23a   :  { %1060 = vrcp.f32 %v579_v45  ;;  %v716_v58 = vmul.f32 -1.442695, %v1460_v46  ;;  %v894_v5 = vpop.f32.mrb[12].mxu1 }
 0x23b   :  { %1062 = vrcp.f32 %v578_v47  ;;  %v1465_v51 = vadd.f32 %v894_v5, %v1414_v56  ;;  %v507_v40 = vpop.f32.mrb[13].mxu1 }
 0x23c   :  { %v1045_v20 = vpop.eup %1044  ;;  %1064 = vpow2.f32 %v717_v49  ;;  %v1468_v52 = vadd.f32 %v1414_v56, %v507_v40 }
 0x23d   :  { %v1047_v2 = vpop.eup %1046  ;;  %v623_v53 = vmul.f32 %v1045_v20, %v1417_v7  ;;  %1066 = vpow2.f32 %v716_v58  ;;  %v719_v54 = vmul.f32 -1.442695, %v1465_v51 }
 0x23e   :  { %v1049_v57 = vpop.eup %1048  ;;  %v622_v60 = vmul.f32 %v1047_v2, %v1420_v50  ;;  %v718_v61 = vmul.f32 -1.442695, %v1468_v52  ;;  %v897_v62 = vpop.f32.mrb[14].mxu1 }
 0x23f   :  { %v1051_v11 = vpop.eup %1050  ;;  %v639_v8 = vadd.f32 %v623_v53, %v1281_v25  ;;  %v581_v1 = vadd.f32 1.0, %v1049_v57  ;;  %1068 = vpow2.f32 %v719_v54  ;;  %v1476_v3 = vadd.f32 %v897_v62, %v1414_v56  ;;  %v517_v10 = vpop.f32.mrb[15].mxu1 }
 0x240   :  { %v1053_v12 = vpop.eup %1052  ;;  %v638_v7 = vadd.f32 %v622_v60, %v1278_v9  ;;  %v580_v13 = vadd.f32 1.0, %v1051_v11  ;;  %1070 = vpow2.f32 %v718_v61  ;;  %v1480_v17 = vadd.f32 %v1414_v56, %v517_v10 }
 0x241   :  { %v1055_v50 = vpop.eup %1054  ;;  %655 = vst [vmem:[#allocation8 + $0x8] sm:$0xff] %v639_v8  ;;  %v625_v14 = vmul.f32 %v1053_v12, %v1425_v0  ;;  %1072 = vrcp.f32 %v581_v1  ;;  %v721_v25 = vmul.f32 -1.442695, %v1476_v3 }
 0x242   :  { %v1057_v16 = vpop.eup %1056  ;;  %654 = vst [vmem:[#allocation8] sm:$0xff] %v638_v7  ;;  %v624_v18 = vmul.f32 %v1055_v50, %v1428_v4  ;;  %1074 = vrcp.f32 %v580_v13  ;;  %v720_v19 = vmul.f32 -1.442695, %v1480_v17 }
 0x243   :  { %v1059_v9 = vpop.eup %1058  ;;  %v641_v24 = vadd.f32 %v625_v14, %v1287_v27  ;;  %v583_v41 = vadd.f32 1.0, %v1057_v16  ;;  %1076 = vpow2.f32 %v721_v25 }
 0x244   :  { %v1061_v56 = vpop.eup %1060  ;;  %v640_v23 = vadd.f32 %v624_v18, %v1283_v26  ;;  %v582_v42 = vadd.f32 1.0, %v1059_v9  ;;  %1078 = vpow2.f32 %v720_v19 }
 0x245   :  { %v1063_v0 = vpop.eup %1062  ;;  %657 = vst [vmem:[#allocation8 + $0x18] sm:$0xff] %v641_v24  ;;  %v627_v21 = vmul.f32 %v1061_v56, %v1433_v55  ;;  %1080 = vrcp.f32 %v583_v41 }
 0x246   :  { %v1065_v44 = vpop.eup %1064  ;;  %656 = vst [vmem:[#allocation8 + $0x10] sm:$0xff] %v640_v23  ;;  %v626_v4 = vmul.f32 %v1063_v0, %v1436_v59  ;;  %1082 = vrcp.f32 %v582_v42 }
 0x247   :  { %v1067_v48 = vpop.eup %1066  ;;  %v643_v27 = vadd.f32 %v627_v21, %v1293_v29  ;;  %v585_v45 = vadd.f32 1.0, %v1065_v44 }
 0x248   :  { %v642_v47 = vadd.f32 %v626_v4, %v1289_v28  ;;  %v584_v49 = vadd.f32 1.0, %v1067_v48 }
 0x249   :  { %v1069_v26 = vpop.eup %1068  ;;  %659 = vst [vmem:[#allocation8 + $0x28] sm:$0xff] %v643_v27  ;;  %1084 = vrcp.f32 %v585_v45 }
 0x24a   :  { %v1071_v58 = vpop.eup %1070  ;;  %658 = vst [vmem:[#allocation8 + $0x20] sm:$0xff] %v642_v47  ;;  %1086 = vrcp.f32 %v584_v49  ;;  %v587_v55 = vadd.f32 1.0, %v1069_v26 }
 0x24b   :  { %v1073_v5 = vpop.eup %1072  ;;  %v586_v40 = vadd.f32 1.0, %v1071_v58 }
 0x24c   :  { %v1075_v20 = vpop.eup %1074  ;;  %v629_v59 = vmul.f32 %v1073_v5, %v1441_v63  ;;  %1088 = vrcp.f32 %v587_v55 }
 0x24d   :  { %v1077_v2 = vpop.eup %1076  ;;  %v628_v29 = vmul.f32 %v1075_v20, %v1444_v6  ;;  %1090 = vrcp.f32 %v586_v40 }
 0x24e   :  { %v1079_v53 = vpop.eup %1078  ;;  %v645_v28 = vadd.f32 %v629_v59, %v1299_v31  ;;  %v589_v54 = vadd.f32 1.0, %v1077_v2 }
 0x24f   :  { %v1081_v57 = vpop.eup %1080  ;;  %v644_v60 = vadd.f32 %v628_v29, %v1295_v30  ;;  %v588_v61 = vadd.f32 1.0, %v1079_v53 }
 0x250   :  { %v1083_v62 = vpop.eup %1082  ;;  %661 = vst [vmem:[#allocation8 + $0x38] sm:$0xff] %v645_v28  ;;  %v631_v11 = vmul.f32 %v1081_v57, %v1449_v15  ;;  %1092 = vrcp.f32 %v589_v54 }
 0x251   :  { %660 = vst [vmem:[#allocation8 + $0x30] sm:$0xff] %v644_v60  ;;  %v630_v63 = vmul.f32 %v1083_v62, %v1452_v22  ;;  %1094 = vrcp.f32 %v588_v61 }
 0x252   :  { %v647_v6 = vadd.f32 %v631_v11, %v1305_v33 }
 0x253   :  { %v1085_v8 = vpop.eup %1084  ;;  %v646_v1 = vadd.f32 %v630_v63, %v1301_v32 }
 0x254   :  { %v1087_v31 = vpop.eup %1086  ;;  %663 = vst [vmem:[#allocation8 + $0x48] sm:$0xff] %v647_v6  ;;  %v633_v10 = vmul.f32 %v1085_v8, %v1457_v43 }
 0x255   :  { %662 = vst [vmem:[#allocation8 + $0x40] sm:$0xff] %v646_v1  ;;  %v632_v30 = vmul.f32 %v1087_v31, %v1460_v46 }
 0x256   :  { %v1089_v12 = vpop.eup %1088  ;;  %v649_v15 = vadd.f32 %v633_v10, %v1311_v35 }
 0x257   :  { %v1091_v7 = vpop.eup %1090  ;;  %v648_v13 = vadd.f32 %v632_v30, %v1307_v34  ;;  %v635_v22 = vmul.f32 %v1089_v12, %v1465_v51 }
 0x258   :  { %665 = vst [vmem:[#allocation8 + $0x58] sm:$0xff] %v649_v15  ;;  %v634_v33 = vmul.f32 %v1091_v7, %v1468_v52 }
 0x259   :  { %664 = vst [vmem:[#allocation8 + $0x50] sm:$0xff] %v648_v13  ;;  %v651_v32 = vadd.f32 %v635_v22, %v1317_v37 }
 0x25a   :  { %v1093_v50 = vpop.eup %1092  ;;  %v650_v43 = vadd.f32 %v634_v33, %v1313_v36 }
 0x25b   :  { %v1095_v14 = vpop.eup %1094  ;;  %667 = vst [vmem:[#allocation8 + $0x68] sm:$0xff] %v651_v32  ;;  %v637_v46 = vmul.f32 %v1093_v50, %v1476_v3 }
 0x25c   :  { %666 = vst [vmem:[#allocation8 + $0x60] sm:$0xff] %v650_v43  ;;  %v636_v34 = vmul.f32 %v1095_v14, %v1480_v17 }
 0x25d   :  { %v653_v35 = vadd.f32 %v637_v46, %v1323_v39 }
 0x25e   :  { %v652_v51 = vadd.f32 %v636_v34, %v1319_v38 }
 0x25f   :  { %669 = vst [vmem:[#allocation8 + $0x78] sm:$0xff] %v653_v35 }
 0x260   :  { %668 = vst [vmem:[#allocation8 + $0x70] sm:$0xff] %v652_v51 }
 0x261   :  { %1173 = shalt.err (!%p1170_p0)
}
 0x262   :  { %s1174_s12 = scalar_lea.hbm %s1532_s5, 2048 }
 0x263   :  { %p1175_p1 = scmp.ne.s32.totalorder %s1532_s5, %s1174_s12  ;;  %p1178_p2 = scmp.lt.u32.totalorder %s1174_s12, %s1532_s5 }
 0x265   :  { %p1180_p3 = pnand %p1178_p2, %p1175_p1 }
 0x267   :  { %1183 = shalt.err (!%p1180_p3)
}
 0x268   :  { %681 = dma.vmem_to_hbm [thread:$0]  %s676_s8, 2048, %s1532_s5, [#allocation4], %s1192_s30, %s1192_s30, %s1193_s6  }
 0x269   :  { %1188 = dma.done.wait [#allocation4], 2048  }
 0x26a   :  { %1189 = vsyncadd [#allocation4], 4294965248 }
 0x26b   :  { %685 = vsyncpa [#allocation3], 1 }
 0x26c   :  { %686 = vsyncpa [#allocation6], 1 }
 0x26d   :  { %687 = vsyncpa [#allocation4], 1 }

</bundles_post_ra>
